<compile_context>
chip_gen: v5e
topology: v5e:2x2
jax: 0.10.0
libtpu: 0.0.40
codegen_flags: <defaults>
</compile_context>

<pallas_src>
import functools

import jax
import jax.numpy as jnp
from jax.experimental import pallas as pl
from jax.experimental.pallas import tpu as pltpu


def _round_up(x, m):
    return (x + m - 1) // m * m


def _apply_activation(x, activation, alpha):
    """Trace-time dispatch on the activation string (runs inside kernels)."""
    if activation == "lk_relu":
        return jnp.where(x >= 0, x, alpha * x)
    if activation == "relu":
        return jnp.maximum(x, 0.0)
    if activation == "sigmoid":
        return jax.nn.sigmoid(x)
    if activation == "tanh":
        return jnp.tanh(x)
    if activation == "softmax":
        # nn.Softmax() (dim=None) on 4D NCHW -> softmax over channels; channels
        # are the last axis of our channels-last layout -> local reduction.
        m = jnp.max(x, axis=-1, keepdims=True)
        e = jnp.exp(x - m)
        denom = jnp.sum(e, axis=-1, keepdims=True)
        return e * pl.reciprocal(denom, approx=True)
    return x  # identity (activation=None in the PyTorch module)


# --------------------------------------------------------------------------
# Pass 1: conv as im2col matmul (+ bias, + optional fused activation)
# --------------------------------------------------------------------------
def _conv_mm_kernel(a_ref, w_ref, b_ref, o_ref, *, fuse_act, activation, alpha):
    acc = jnp.dot(a_ref[...], w_ref[...], preferred_element_type=jnp.float32)
    acc = acc + b_ref[...].astype(jnp.float32)
    if fuse_act:
        acc = _apply_activation(acc, activation, alpha)
    o_ref[...] = acc.astype(o_ref.dtype)


def _conv_matmul(a, w2, b2, *, fuse_act, activation, alpha):
    m, kdim = a.shape
    co = w2.shape[1]

    tm = 256 if m >= 256 else _round_up(m, 8)
    m_pad = _round_up(m, tm)
    if m_pad != m:
        a = jnp.pad(a, ((0, m_pad - m), (0, 0)))

    kernel = functools.partial(
        _conv_mm_kernel, fuse_act=fuse_act, activation=activation, alpha=alpha
    )
    y = pl.pallas_call(
        kernel,
        out_shape=jax.ShapeDtypeStruct((m_pad, co), a.dtype),
        grid_spec=pl.GridSpec(
            grid=(m_pad // tm,),
            in_specs=[
                pl.BlockSpec((tm, kdim), lambda i: (i, 0)),
                pl.BlockSpec((kdim, co), lambda i: (0, 0)),
                pl.BlockSpec((1, co), lambda i: (0, 0)),
            ],
            out_specs=pl.BlockSpec((tm, co), lambda i: (i, 0)),
        ),
        compiler_params=pltpu.CompilerParams(
            dimension_semantics=("parallel",),
        ),
    )(a, w2, b2)
    return y[:m]


# --------------------------------------------------------------------------
# Pass 2: per-(n, c) scale/shift normalization (+ optional fused activation)
# --------------------------------------------------------------------------
def _norm_act_kernel(y_ref, s_ref, t_ref, o_ref, *, fuse_act, activation, alpha):
    y = y_ref[...].astype(jnp.float32)                       # (1, TP, C)
    out = y * s_ref[...].astype(jnp.float32) + t_ref[...].astype(jnp.float32)
    if fuse_act:
        out = _apply_activation(out, activation, alpha)
    o_ref[...] = out.astype(o_ref.dtype)


def _norm_act(y, scale_nc, shift_nc, n, p, co, *, fuse_act, activation, alpha):
    y3 = y.reshape(n, p, co)
    if p <= 1024:
        tp = _round_up(p, 8)
        p_pad = tp
    else:
        tp = 1024
        p_pad = _round_up(p, tp)
    if p_pad != p:
        y3 = jnp.pad(y3, ((0, 0), (0, p_pad - p), (0, 0)))

    s3 = scale_nc.reshape(n, 1, co).astype(jnp.float32)
    t3 = shift_nc.reshape(n, 1, co).astype(jnp.float32)

    kernel = functools.partial(
        _norm_act_kernel, fuse_act=fuse_act, activation=activation, alpha=alpha
    )
    out3 = pl.pallas_call(
        kernel,
        out_shape=jax.ShapeDtypeStruct((n, p_pad, co), y.dtype),
        grid_spec=pl.GridSpec(
            grid=(n, p_pad // tp),
            in_specs=[
                pl.BlockSpec((1, tp, co), lambda i, j: (i, j, 0)),
                pl.BlockSpec((1, 1, co), lambda i, j: (i, 0, 0)),
                pl.BlockSpec((1, 1, co), lambda i, j: (i, 0, 0)),
            ],
            out_specs=pl.BlockSpec((1, tp, co), lambda i, j: (i, j, 0)),
        ),
        compiler_params=pltpu.CompilerParams(
            dimension_semantics=("parallel", "parallel"),
        ),
    )(y3, s3, t3)
    return out3[:, :p, :]


# --------------------------------------------------------------------------
# Conv2DLayer.forward
# --------------------------------------------------------------------------
def conv2d_layer(
    x, weight, bias=None, *,
    kernel_size=3, scale="none", use_pad=True, use_bias=True,
    norm_type="bn2d", norm_before=True,
    activation="lk_relu", alpha_relu=0.15,
    gamma=None, beta=None, eps=1e-5,
):
    """x: (N, Cin, H, W) NCHW; weight: (Cout, Cin, K, K); bias: (Cout,)."""
    n, ci, h, w = x.shape
    co = weight.shape[0]
    k = kernel_size
    stride = 2 if scale == "down" else 1

    # scale_layer: 2x nearest-neighbor upsample (matches F.interpolate nearest).
    if scale == "up":
        x = jnp.repeat(jnp.repeat(x, 2, axis=2), 2, axis=3)
        h, w = 2 * h, 2 * w

    # ReflectionPad2d(k // 2)
    if use_pad:
        p = k // 2
        x = jnp.pad(x, ((0, 0), (0, 0), (p, p), (p, p)), mode="reflect")
        h, w = h + 2 * p, w + 2 * p

    oh = (h - k) // stride + 1
    ow = (w - k) // stride + 1

    # im2col, channels-last, ordered (kh, kw, ci) to match the reshaped weight.
    x_nhwc = jnp.transpose(x, (0, 2, 3, 1))
    cols = []
    for kh in range(k):
        for kw in range(k):
            cols.append(
                x_nhwc[:, kh:kh + stride * (oh - 1) + 1:stride,
                       kw:kw + stride * (ow - 1) + 1:stride, :]
            )
    a = jnp.concatenate(cols, axis=-1).reshape(n * oh * ow, k * k * ci)

    # (Cout, Cin, K, K) -> (K*K*Cin, Cout)
    w2 = jnp.transpose(weight, (2, 3, 1, 0)).reshape(k * k * ci, co).astype(x.dtype)
    if use_bias and bias is not None:
        b2 = bias.reshape(1, co).astype(jnp.float32)
    else:
        b2 = jnp.zeros((1, co), jnp.float32)

    act_known = activation in ("lk_relu", "relu", "sigmoid", "tanh", "softmax")
    need_norm = norm_type not in ("none", None)
    fuse_act_pass1 = act_known and ((not need_norm) or (not norm_before))
    fuse_act_pass2 = act_known and need_norm and norm_before

    # Pass 1: conv (+ bias, + activation if it precedes the norm or norm is off).
    y = _conv_matmul(a, w2, b2, fuse_act=fuse_act_pass1,
                     activation=activation, alpha=alpha_relu)     # (N*OH*OW, Cout)

    p_spatial = oh * ow

    if need_norm:
        yf = y.astype(jnp.float32)
        if norm_type == "bn2d":
            # Training-mode BatchNorm2d: biased batch stats over (N, H, W).
            mean = jnp.mean(yf, axis=0)
            var = jnp.mean(yf * yf, axis=0) - mean * mean
            g = jnp.ones((co,), jnp.float32) if gamma is None else gamma.astype(jnp.float32)
            bt = jnp.zeros((co,), jnp.float32) if beta is None else beta.astype(jnp.float32)
            sc = g * jax.lax.rsqrt(var + eps)
            sh = bt - mean * sc
            scale_nc = jnp.broadcast_to(sc, (n, co))
            shift_nc = jnp.broadcast_to(sh, (n, co))
        elif norm_type == "in2d":
            # InstanceNorm2d (affine=False): per-(n, c) stats over spatial dims.
            y3 = yf.reshape(n, p_spatial, co)
            mean = jnp.mean(y3, axis=1)
            var = jnp.mean(y3 * y3, axis=1) - mean * mean
            scale_nc = jax.lax.rsqrt(var + eps)
            shift_nc = -mean * scale_nc
        else:
            raise NotImplementedError(f"norm_type={norm_type} is not implemented")

        out2 = _norm_act(y, scale_nc, shift_nc, n, p_spatial, co,
                         fuse_act=fuse_act_pass2, activation=activation,
                         alpha=alpha_relu)                        # (N, OH*OW, Cout)
        out_nhwc = out2.reshape(n, oh, ow, co)
    else:
        out_nhwc = y.reshape(n, oh, ow, co)

    return jnp.transpose(out_nhwc, (0, 3, 1, 2))


# --------------------------------------------------------------------------
# Pure-JAX reference for validation
# --------------------------------------------------------------------------
def _reference(x, weight, bias, *, kernel_size, scale, use_pad, use_bias,
               norm_type, norm_before, activation, alpha_relu, eps=1e-5):
    k = kernel_size
    stride = 2 if scale == "down" else 1
    if scale == "up":
        x = jnp.repeat(jnp.repeat(x, 2, axis=2), 2, axis=3)
    if use_pad:
        p = k // 2
        x = jnp.pad(x, ((0, 0), (0, 0), (p, p), (p, p)), mode="reflect")
    out = jax.lax.conv_general_dilated(
        x.astype(jnp.float32), weight.astype(jnp.float32),
        window_strides=(stride, stride), padding="VALID",
        dimension_numbers=("NCHW", "OIHW", "NCHW"),
        precision=jax.lax.Precision.HIGHEST)
    if use_bias and bias is not None:
        out = out + bias.reshape(1, -1, 1, 1)

    def norm_fn(t):
        if norm_type == "bn2d":
            mean = jnp.mean(t, axis=(0, 2, 3), keepdims=True)
            var = jnp.mean((t - mean) ** 2, axis=(0, 2, 3), keepdims=True)
            return (t - mean) / jnp.sqrt(var + eps)
        if norm_type == "in2d":
            mean = jnp.mean(t, axis=(2, 3), keepdims=True)
            var = jnp.mean((t - mean) ** 2, axis=(2, 3), keepdims=True)
            return (t - mean) / jnp.sqrt(var + eps)
        return t

    def act_fn(t):
        if activation == "lk_relu":
            return jnp.where(t >= 0, t, alpha_relu * t)
        if activation == "relu":
            return jnp.maximum(t, 0.0)
        if activation == "sigmoid":
            return jax.nn.sigmoid(t)
        if activation == "tanh":
            return jnp.tanh(t)
        if activation == "softmax":
            return jax.nn.softmax(t, axis=1)
        return t

    if norm_before:
        return act_fn(norm_fn(out))
    return norm_fn(act_fn(out))


if __name__ == "__main__":
    key = jax.random.PRNGKey(0)
    k0, k1, k2 = jax.random.split(key, 3)
    n, ci, co, hw, ks = 2, 4, 8, 16, 3
    x = jax.random.normal(k0, (n, ci, hw, hw), dtype=jnp.float32)
    weight = jax.random.normal(k1, (co, ci, ks, ks), dtype=jnp.float32) * 0.2
    bias = jax.random.normal(k2, (co,), dtype=jnp.float32) * 0.1

    configs = [
        # Default Conv2DLayer (with a valid norm): conv -> BN2d -> LeakyReLU(0.15)
        dict(scale="none", use_pad=True, use_bias=True, norm_type="bn2d",
             norm_before=True, activation="lk_relu", alpha_relu=0.15),
        # Downscale path, no norm, fused tanh epilogue in the matmul kernel.
        dict(scale="down", use_pad=True, use_bias=True, norm_type="none",
             norm_before=True, activation="tanh", alpha_relu=0.15),
        # Upscale path, InstanceNorm2d + channel softmax in the fused norm kernel.
        dict(scale="up", use_pad=True, use_bias=True, norm_type="in2d",
             norm_before=True, activation="softmax", alpha_relu=0.15),
    ]

    ok = True
    for cfg in configs:
        out = conv2d_layer(x, weight, bias, kernel_size=ks, **cfg)
        out = jax.block_until_ready(out)
        ref = _reference(x, weight, bias, kernel_size=ks, **cfg)
        ref = jax.block_until_ready(ref)
        if out.shape != ref.shape or not jnp.allclose(out, ref, atol=2e-2, rtol=2e-2):
            err = (float(jnp.max(jnp.abs(out - ref)))
                   if out.shape == ref.shape else float("nan"))
            print(f"MISMATCH for config={cfg} max_abs_err={err}")
            ok = False

    if ok:
        print("KERNEL_OK")
</pallas_src>

<mosaic_0001>
module attributes {stable_mosaic.version = 11 : i64} {
  func.func @_conv_mm_kernel(%arg0: i32, %arg1: memref<256x36xf32, #tpu.memory_space<vmem>>, %arg2: memref<36x8xf32, #tpu.memory_space<vmem>>, %arg3: memref<1x8xf32, #tpu.memory_space<vmem>>, %arg4: memref<256x8xf32, #tpu.memory_space<vmem>>) attributes {dimension_semantics = [#tpu.dimension_semantics<parallel>], iteration_bounds = array<i64: 2>, scalar_prefetch = 0 : i64, scratch_operands = 0 : i64, tpu.core_type = #tpu.core_type<tc>, window_params = [{transform_indices = @transform_0, window_bounds = array<i64: 256, 36>}, {pipeline_mode = #tpu.pipeline_mode<synchronous>, transform_indices = @transform_1, window_bounds = array<i64: 36, 8>}, {pipeline_mode = #tpu.pipeline_mode<synchronous>, transform_indices = @transform_2, window_bounds = array<i64: 1, 8>}, {transform_indices = @transform_3, window_bounds = array<i64: 256, 8>}]} {
    %c0 = arith.constant 0 : index
    %c0_0 = arith.constant 0 : index
    %0 = vector.load %arg1[%c0, %c0_0] : memref<256x36xf32, #tpu.memory_space<vmem>>, vector<256x36xf32>
    %c0_1 = arith.constant 0 : index
    %c0_2 = arith.constant 0 : index
    %1 = vector.load %arg2[%c0_1, %c0_2] : memref<36x8xf32, #tpu.memory_space<vmem>>, vector<36x8xf32>
    %cst = arith.constant dense<0.000000e+00> : vector<256x8xf32>
    %2 = tpu.matmul %0, %1, %cst {dimension_numbers = #tpu.dot_dimension_numbers<[1], [0], [0], [1], [0, 0, 1, 1], [], []>} : vector<256x36xf32>, vector<36x8xf32>, vector<256x8xf32> -> vector<256x8xf32>
    %c0_3 = arith.constant 0 : index
    %c0_4 = arith.constant 0 : index
    %3 = vector.load %arg3[%c0_3, %c0_4] : memref<1x8xf32, #tpu.memory_space<vmem>>, vector<1x8xf32>
    %4 = vector.broadcast %3 : vector<1x8xf32> to vector<256x8xf32>
    %5 = arith.addf %2, %4 : vector<256x8xf32>
    %c0_5 = arith.constant 0 : index
    %c0_6 = arith.constant 0 : index
    %6 = vector.load %arg4[%c0_5, %c0_6] : memref<256x8xf32, #tpu.memory_space<vmem>>, vector<256x8xf32>
    tpu.vector_store %arg4[%c0_5, %c0_6], %5 {strides = array<i32>} : memref<256x8xf32, #tpu.memory_space<vmem>>, vector<256x8xf32>,
    return
  }
  func.func @transform_0(%arg0: i32) -> (i32, i32) {
    %c0_i32 = arith.constant 0 : i32
    %c0_i32_0 = arith.constant 0 : i32
    return %arg0, %c0_i32 : i32, i32
  }
  func.func @transform_1(%arg0: i32) -> (i32, i32) {
    %c0_i32 = arith.constant 0 : i32
    %c0_i32_0 = arith.constant 0 : i32
    %c0_i32_1 = arith.constant 0 : i32
    return %c0_i32, %c0_i32_0 : i32, i32
  }
  func.func @transform_2(%arg0: i32) -> (i32, i32) {
    %c0_i32 = arith.constant 0 : i32
    %c0_i32_0 = arith.constant 0 : i32
    %c0_i32_1 = arith.constant 0 : i32
    return %c0_i32, %c0_i32_0 : i32, i32
  }
  func.func @transform_3(%arg0: i32) -> (i32, i32) {
    %c0_i32 = arith.constant 0 : i32
    %c0_i32_0 = arith.constant 0 : i32
    return %arg0, %c0_i32 : i32, i32
  }
}

</mosaic_0001>

<bundles_post_ra>
// kernel: tpu_custom_call.1
= control target key start
LH: loop header
LB: loop body
LE: loop exit
PB: predicated region body
PF: predicated region fallthrough
CT: control target
= control target key end

     0   :  { %s614_s12 = smov 0   ;;  %s822_s0 = inlined_call_operand.vmem [shape: f32[512,36], index: 0, kind: input, shape index: {}]   ;;  %s823_s1 = inlined_call_operand.vmem [shape: f32[36,8], index: 1, kind: input, shape index: {}]   ;;  %s824_s2 = inlined_call_operand.vmem [shape: f32[1,8], index: 2, kind: input, shape index: {}]   ;;  %s825_s3 = inlined_call_operand.vmem [shape: f32[512,8], index: 3, kind: output, shape index: {}]  }
   0x1 LB: > { %s518_s13 = sadd.s32 4294967295, %s592_s12   ;;  %p522_p0 = scmp.ge.s32.totalorder %s592_s12, 1  ;;  %s592_s12 = sphi %s614_s12, %s13_s12  }
   0x2   : > { %p138_p1 = scmp.lt.s32.totalorder %s592_s12, 3 }
   0x4   : > { %p139_p2 = pnand %p522_p0, %p138_p1 }
   0x5   : > { %s523_s18 = sshll.u32 (!%p139_p2), %s518_s13, 5 }
   0x6   : > { %142 = sbr.rel (%p139_p2) target bundleno = 213 (0xd5), region = 32  ;;  %p163_p3 = scmp.lt.s32.totalorder (!%p139_p2), %s523_s18, 63 }
   0xb   : > { %v210_v0 = vld [vmem:[%s823_s1 + $0x20] sm:$0xf]  ;;  %vm312_vm0 = vcmask 1043456   ;;  %v209_v1 = vld [vmem:[%s823_s1 + $0x18] sm:$0xff]  ;;  %v208_v2 = vld [vmem:[%s823_s1 + $0x10] sm:$0xff]  ;;  %s827_s18 = smov (!%p163_p3, %s523_s18), 63 }
   0xc   : > { %563 = vmatpush.msk.msra.mxu2 %vm312_vm0, %v210_v0  ;;  %564 = vmatpush.msk.msra.mxu3 %vm312_vm0, %v210_v0  ;;  %v207_v3 = vld [vmem:[%s823_s1 + $0x8] sm:$0xff]  ;;  %s524_s23 = sshll.u32 %s827_s18, 3  ;;  %v206_v4 = vld [vmem:[%s823_s1] sm:$0xff]  ;;  %vm215_vm1 = vcmask 293888   ;;  %vm429_vm2 = vcmask 64512  }
   0xd   : > { %527 = vmatpush.msk.msra.mxu0 %vm312_vm0, %v210_v0  ;;  %562 = vmatpush.msk.msra.mxu1 %vm312_vm0, %v210_v0  ;;  %s645_s28 = scalar_lea.vmem %s822_s0, %s524_s23  ;;  %v714_v37 = vld [vmem:[%s824_s2] ss:$0 sm:$0xff]  ;;  %s721_s6 = scalar_lea.vmem %s825_s3, %s524_s23 }
   0xe   : > { %566 = vmatpush.msra.mxu2 %v209_v1  ;;  %567 = vmatpush.msra.mxu3 %v209_v1  ;;  %v190_v5 = vld [vmem:[%s645_s28 + $0x80] sm:$0xff]  ;;  %v191_v9 = vld [vmem:[%s645_s28 + $0x88] sm:$0xff]  ;;  %v192_v13 = vld [vmem:[%s645_s28 + $0x90] sm:$0xff] }
   0xf   : > { %328 = vmatpush.msra.mxu0 %v209_v1  ;;  %565 = vmatpush.msra.mxu1 %v209_v1  ;;  %v198_v6 = vld [vmem:[%s645_s28 + $0xc0] sm:$0xff]  ;;  %v199_v10 = vld [vmem:[%s645_s28 + $0xc8] sm:$0xff]  ;;  %v200_v14 = vld [vmem:[%s645_s28 + $0xd0] sm:$0xff] }
  0x10   : > { %569 = vmatpush.msra.mxu2 %v208_v2  ;;  %570 = vmatpush.msra.mxu3 %v208_v2  ;;  %v174_v7 = vld [vmem:[%s645_s28] sm:$0xff]  ;;  %v175_v11 = vld [vmem:[%s645_s28 + $0x8] sm:$0xff]  ;;  %v176_v15 = vld [vmem:[%s645_s28 + $0x10] sm:$0xff] }
  0x11   : > { %329 = vmatpush.msra.mxu0 %v208_v2  ;;  %568 = vmatpush.msra.mxu1 %v208_v2  ;;  %v182_v8 = vld [vmem:[%s645_s28 + $0x40] sm:$0xff]  ;;  %v183_v12 = vld [vmem:[%s645_s28 + $0x48] sm:$0xff]  ;;  %v184_v16 = vld [vmem:[%s645_s28 + $0x50] sm:$0xff] }
  0x12   : > { %572 = vmatpush.msra.mxu2 %v207_v3  ;;  %573 = vmatpush.msra.mxu3 %v207_v3  ;;  %v193_v17 = vld [vmem:[%s645_s28 + $0x98] sm:$0xff]  ;;  %v194_v21 = vld [vmem:[%s645_s28 + $0xa0] sm:$0xff]  ;;  %v195_v25 = vld [vmem:[%s645_s28 + $0xa8] sm:$0xff] }
  0x13   : > { %330 = vmatpush.msra.mxu0 %v207_v3  ;;  %571 = vmatpush.msra.mxu1 %v207_v3  ;;  %v201_v18 = vld [vmem:[%s645_s28 + $0xd8] sm:$0xff]  ;;  %v202_v22 = vld [vmem:[%s645_s28 + $0xe0] sm:$0xff]  ;;  %v203_v26 = vld [vmem:[%s645_s28 + $0xe8] sm:$0xff] }
  0x14   : > { %575 = vmatpush.msra.mxu2 %v206_v4  ;;  %576 = vmatpush.msra.mxu3 %v206_v4  ;;  %v177_v19 = vld [vmem:[%s645_s28 + $0x18] sm:$0xff]  ;;  %v178_v23 = vld [vmem:[%s645_s28 + $0x20] sm:$0xff]  ;;  %v179_v27 = vld [vmem:[%s645_s28 + $0x28] sm:$0xff] }
  0x15   : > { %544 = vmatmul.msk.f32.vlgmr.msra.gmra.mxu2 %vm215_vm1, %v190_v5  ;;  %552 = vmatmul.msk.f32.vlgmr.msra.gmra.mxu3 %vm215_vm1, %v198_v6  ;;  %v185_v20 = vld [vmem:[%s645_s28 + $0x58] sm:$0xff]  ;;  %v186_v24 = vld [vmem:[%s645_s28 + $0x60] sm:$0xff]  ;;  %v187_v28 = vld [vmem:[%s645_s28 + $0x68] sm:$0xff] }
  0x16   : > { %331 = vmatpush.msra.mxu0 %v206_v4  ;;  %574 = vmatpush.msra.mxu1 %v206_v4  ;;  %v196_v29 = vld [vmem:[%s645_s28 + $0xb0] sm:$0xff]  ;;  %v197_v33 = vld [vmem:[%s645_s28 + $0xb8] sm:$0xff] }
  0x17   : > { %528 = vmatmul.msk.f32.vlgmr.msra.gmra.mxu0 %vm215_vm1, %v174_v7  ;;  %536 = vmatmul.msk.f32.vlgmr.msra.gmra.mxu1 %vm215_vm1, %v182_v8  ;;  %v204_v30 = vld [vmem:[%s645_s28 + $0xf0] sm:$0xff]  ;;  %v205_v34 = vld [vmem:[%s645_s28 + $0xf8] sm:$0xff] }
  0x18   : > { %v180_v31 = vld [vmem:[%s645_s28 + $0x30] sm:$0xff]  ;;  %v181_v35 = vld [vmem:[%s645_s28 + $0x38] sm:$0xff] }
  0x19   : > { %v188_v32 = vld [vmem:[%s645_s28 + $0x70] sm:$0xff]  ;;  %v189_v36 = vld [vmem:[%s645_s28 + $0x78] sm:$0xff] }
  0x1d   : > { %545 = vmatmul.msk.f32.gmra.mxu2 %vm215_vm1, %v191_v9  ;;  %553 = vmatmul.msk.f32.gmra.mxu3 %vm215_vm1, %v199_v10 }
  0x1f   : > { %529 = vmatmul.msk.f32.gmra.mxu0 %vm215_vm1, %v175_v11  ;;  %537 = vmatmul.msk.f32.gmra.mxu1 %vm215_vm1, %v183_v12 }
  0x25   : > { %546 = vmatmul.msk.f32.gmra.mxu2 %vm215_vm1, %v192_v13  ;;  %554 = vmatmul.msk.f32.gmra.mxu3 %vm215_vm1, %v200_v14 }
  0x27   : > { %530 = vmatmul.msk.f32.gmra.mxu0 %vm215_vm1, %v176_v15  ;;  %538 = vmatmul.msk.f32.gmra.mxu1 %vm215_vm1, %v184_v16 }
  0x2d   : > { %547 = vmatmul.msk.f32.gmra.mxu2 %vm215_vm1, %v193_v17  ;;  %555 = vmatmul.msk.f32.gmra.mxu3 %vm215_vm1, %v201_v18 }
  0x2f   : > { %531 = vmatmul.msk.f32.gmra.mxu0 %vm215_vm1, %v177_v19  ;;  %539 = vmatmul.msk.f32.gmra.mxu1 %vm215_vm1, %v185_v20 }
  0x35   : > { %548 = vmatmul.msk.f32.gmra.mxu2 %vm215_vm1, %v194_v21  ;;  %556 = vmatmul.msk.f32.gmra.mxu3 %vm215_vm1, %v202_v22 }
  0x37   : > { %532 = vmatmul.msk.f32.gmra.mxu0 %vm215_vm1, %v178_v23  ;;  %540 = vmatmul.msk.f32.gmra.mxu1 %vm215_vm1, %v186_v24 }
  0x3d   : > { %549 = vmatmul.msk.f32.gmra.mxu2 %vm215_vm1, %v195_v25  ;;  %557 = vmatmul.msk.f32.gmra.mxu3 %vm215_vm1, %v203_v26 }
  0x3f   : > { %533 = vmatmul.msk.f32.gmra.mxu0 %vm215_vm1, %v179_v27  ;;  %541 = vmatmul.msk.f32.gmra.mxu1 %vm215_vm1, %v187_v28 }
  0x45   : > { %550 = vmatmul.msk.f32.gmra.mxu2 %vm215_vm1, %v196_v29  ;;  %558 = vmatmul.msk.f32.gmra.mxu3 %vm215_vm1, %v204_v30 }
  0x47   : > { %534 = vmatmul.msk.f32.gmra.mxu0 %vm215_vm1, %v180_v31  ;;  %542 = vmatmul.msk.f32.gmra.mxu1 %vm215_vm1, %v188_v32 }
  0x4d   : > { %551 = vmatmul.msk.f32.gmra.mxu2 %vm215_vm1, %v197_v33  ;;  %559 = vmatmul.msk.f32.gmra.mxu3 %vm215_vm1, %v205_v34 }
  0x4f   : > { %535 = vmatmul.msk.f32.gmra.mxu0 %vm215_vm1, %v181_v35  ;;  %543 = vmatmul.msk.f32.gmra.mxu1 %vm215_vm1, %v189_v36 }
  0x94   : > { %v333_v38 = vpop.f32.mrf.mxu0  ;;  %v357_v39 = vpop.f32.mrf.mxu1 }
  0x95   : > { %v334_v40 = vadd.f32 %v714_v37, %v333_v38  ;;  %v358_v41 = vadd.f32 %v714_v37, %v357_v39 }
  0x97   : > { %430 = vst.msk [vmem:[%s721_s6] sm:$0xff] %vm429_vm2, %v334_v40 }
  0x98   : > { %438 = vst.msk [vmem:[%s721_s6 + $0x40] sm:$0xff] %vm429_vm2, %v358_v41  ;;  %v381_v42 = vpop.f32.mrf.mxu2  ;;  %v405_v43 = vpop.f32.mrf.mxu3 }
  0x99   : > { %v382_v44 = vadd.f32 %v714_v37, %v381_v42  ;;  %v406_v45 = vadd.f32 %v714_v37, %v405_v43 }
  0x9b   : > { %446 = vst.msk [vmem:[%s721_s6 + $0x80] sm:$0xff] %vm429_vm2, %v382_v44 }
  0x9c   : > { %454 = vst.msk [vmem:[%s721_s6 + $0xc0] sm:$0xff] %vm429_vm2, %v406_v45  ;;  %v336_v46 = vpop.f32.mrf.mxu0  ;;  %v360_v47 = vpop.f32.mrf.mxu1 }
  0x9d   : > { %v337_v48 = vadd.f32 %v714_v37, %v336_v46  ;;  %v361_v49 = vadd.f32 %v714_v37, %v360_v47 }
  0x9f   : > { %431 = vst.msk [vmem:[%s721_s6 + $0x8] sm:$0xff] %vm429_vm2, %v337_v48 }
  0xa0   : > { %439 = vst.msk [vmem:[%s721_s6 + $0x48] sm:$0xff] %vm429_vm2, %v361_v49  ;;  %v384_v50 = vpop.f32.mrf.mxu2  ;;  %v408_v51 = vpop.f32.mrf.mxu3 }
  0xa1   : > { %v385_v52 = vadd.f32 %v714_v37, %v384_v50  ;;  %v409_v53 = vadd.f32 %v714_v37, %v408_v51 }
  0xa3   : > { %447 = vst.msk [vmem:[%s721_s6 + $0x88] sm:$0xff] %vm429_vm2, %v385_v52 }
  0xa4   : > { %455 = vst.msk [vmem:[%s721_s6 + $0xc8] sm:$0xff] %vm429_vm2, %v409_v53  ;;  %v339_v54 = vpop.f32.mrf.mxu0  ;;  %v363_v55 = vpop.f32.mrf.mxu1 }
  0xa5   : > { %v340_v56 = vadd.f32 %v714_v37, %v339_v54  ;;  %v364_v57 = vadd.f32 %v714_v37, %v363_v55 }
  0xa7   : > { %432 = vst.msk [vmem:[%s721_s6 + $0x10] sm:$0xff] %vm429_vm2, %v340_v56 }
  0xa8   : > { %440 = vst.msk [vmem:[%s721_s6 + $0x50] sm:$0xff] %vm429_vm2, %v364_v57  ;;  %v387_v58 = vpop.f32.mrf.mxu2  ;;  %v411_v59 = vpop.f32.mrf.mxu3 }
  0xa9   : > { %v388_v60 = vadd.f32 %v714_v37, %v387_v58  ;;  %v412_v61 = vadd.f32 %v714_v37, %v411_v59 }
  0xab   : > { %448 = vst.msk [vmem:[%s721_s6 + $0x90] sm:$0xff] %vm429_vm2, %v388_v60 }
  0xac   : > { %456 = vst.msk [vmem:[%s721_s6 + $0xd0] sm:$0xff] %vm429_vm2, %v412_v61  ;;  %v342_v62 = vpop.f32.mrf.mxu0  ;;  %v366_v63 = vpop.f32.mrf.mxu1 }
  0xad   : > { %v343_v0 = vadd.f32 %v714_v37, %v342_v62  ;;  %v367_v1 = vadd.f32 %v714_v37, %v366_v63 }
  0xaf   : > { %433 = vst.msk [vmem:[%s721_s6 + $0x18] sm:$0xff] %vm429_vm2, %v343_v0 }
  0xb0   : > { %441 = vst.msk [vmem:[%s721_s6 + $0x58] sm:$0xff] %vm429_vm2, %v367_v1  ;;  %v390_v2 = vpop.f32.mrf.mxu2  ;;  %v414_v3 = vpop.f32.mrf.mxu3 }
  0xb1   : > { %v391_v4 = vadd.f32 %v714_v37, %v390_v2  ;;  %v415_v5 = vadd.f32 %v714_v37, %v414_v3 }
  0xb3   : > { %449 = vst.msk [vmem:[%s721_s6 + $0x98] sm:$0xff] %vm429_vm2, %v391_v4 }
  0xb4   : > { %457 = vst.msk [vmem:[%s721_s6 + $0xd8] sm:$0xff] %vm429_vm2, %v415_v5  ;;  %v345_v6 = vpop.f32.mrf.mxu0  ;;  %v369_v7 = vpop.f32.mrf.mxu1 }
  0xb5   : > { %v346_v8 = vadd.f32 %v714_v37, %v345_v6  ;;  %v370_v9 = vadd.f32 %v714_v37, %v369_v7 }
  0xb7   : > { %434 = vst.msk [vmem:[%s721_s6 + $0x20] sm:$0xff] %vm429_vm2, %v346_v8 }
  0xb8   : > { %442 = vst.msk [vmem:[%s721_s6 + $0x60] sm:$0xff] %vm429_vm2, %v370_v9  ;;  %v393_v10 = vpop.f32.mrf.mxu2  ;;  %v417_v11 = vpop.f32.mrf.mxu3 }
  0xb9   : > { %v394_v12 = vadd.f32 %v714_v37, %v393_v10  ;;  %v418_v13 = vadd.f32 %v714_v37, %v417_v11 }
  0xbb   : > { %450 = vst.msk [vmem:[%s721_s6 + $0xa0] sm:$0xff] %vm429_vm2, %v394_v12 }
  0xbc   : > { %458 = vst.msk [vmem:[%s721_s6 + $0xe0] sm:$0xff] %vm429_vm2, %v418_v13  ;;  %v348_v14 = vpop.f32.mrf.mxu0  ;;  %v372_v15 = vpop.f32.mrf.mxu1 }
  0xbd   : > { %v349_v16 = vadd.f32 %v714_v37, %v348_v14  ;;  %v373_v17 = vadd.f32 %v714_v37, %v372_v15 }
  0xbf   : > { %435 = vst.msk [vmem:[%s721_s6 + $0x28] sm:$0xff] %vm429_vm2, %v349_v16 }
  0xc0   : > { %443 = vst.msk [vmem:[%s721_s6 + $0x68] sm:$0xff] %vm429_vm2, %v373_v17  ;;  %v396_v18 = vpop.f32.mrf.mxu2  ;;  %v420_v19 = vpop.f32.mrf.mxu3 }
  0xc1   : > { %v397_v20 = vadd.f32 %v714_v37, %v396_v18  ;;  %v421_v21 = vadd.f32 %v714_v37, %v420_v19 }
  0xc3   : > { %451 = vst.msk [vmem:[%s721_s6 + $0xa8] sm:$0xff] %vm429_vm2, %v397_v20 }
  0xc4   : > { %459 = vst.msk [vmem:[%s721_s6 + $0xe8] sm:$0xff] %vm429_vm2, %v421_v21  ;;  %v351_v22 = vpop.f32.mrf.mxu0  ;;  %v375_v23 = vpop.f32.mrf.mxu1 }
  0xc5   : > { %v352_v24 = vadd.f32 %v714_v37, %v351_v22  ;;  %v376_v25 = vadd.f32 %v714_v37, %v375_v23 }
  0xc7   : > { %436 = vst.msk [vmem:[%s721_s6 + $0x30] sm:$0xff] %vm429_vm2, %v352_v24 }
  0xc8   : > { %444 = vst.msk [vmem:[%s721_s6 + $0x70] sm:$0xff] %vm429_vm2, %v376_v25  ;;  %v399_v26 = vpop.f32.mrf.mxu2  ;;  %v423_v27 = vpop.f32.mrf.mxu3 }
  0xc9   : > { %v400_v28 = vadd.f32 %v714_v37, %v399_v26  ;;  %v424_v29 = vadd.f32 %v714_v37, %v423_v27 }
  0xcb   : > { %452 = vst.msk [vmem:[%s721_s6 + $0xb0] sm:$0xff] %vm429_vm2, %v400_v28 }
  0xcc   : > { %460 = vst.msk [vmem:[%s721_s6 + $0xf0] sm:$0xff] %vm429_vm2, %v424_v29  ;;  %v354_v30 = vpop.f32.mrf.mxu0  ;;  %v378_v31 = vpop.f32.mrf.mxu1 }
  0xcd   : > { %v355_v32 = vadd.f32 %v714_v37, %v354_v30  ;;  %v379_v33 = vadd.f32 %v714_v37, %v378_v31 }
  0xcf   : > { %437 = vst.msk [vmem:[%s721_s6 + $0x38] sm:$0xff] %vm429_vm2, %v355_v32 }
  0xd0   : > { %445 = vst.msk [vmem:[%s721_s6 + $0x78] sm:$0xff] %vm429_vm2, %v379_v33  ;;  %v402_v34 = vpop.f32.mrf.mxu2  ;;  %v426_v35 = vpop.f32.mrf.mxu3 }
  0xd1   : > { %v403_v36 = vadd.f32 %v714_v37, %v402_v34  ;;  %v427_v38 = vadd.f32 %v714_v37, %v426_v35 }
  0xd3   : > { %453 = vst.msk [vmem:[%s721_s6 + $0xb8] sm:$0xff] %vm429_vm2, %v403_v36 }
  0xd4   : > { %461 = vst.msk [vmem:[%s721_s6 + $0xf8] sm:$0xff] %vm429_vm2, %v427_v38 }
  0xd5 PF: > { %s13_s12 = sadd.s32 1, %s592_s12  }
  0xd6   : > { %p10_p4 = scmp.ge.s32.totalorder %s13_s12, 4  }
  0xd8   :  { %12 = sbr.rel (!%p10_p4) target bundleno = 1 (0x1), region = 62 }

</bundles_post_ra>
